<compile_context>
chip_gen: v7x
topology: tpu7x:2x2x1
jax: 0.10.0
libtpu: 0.0.40
codegen_flags: <defaults>
</compile_context>

<pallas_src>
import functools

import jax
import jax.numpy as jnp
from jax.experimental import pallas as pl
from jax.experimental.pallas import tpu as pltpu


def _round_up(x, m):
    return ((x + m - 1) // m) * m


# -----------------------------------------------------------------------------
# Fused matmul + bias + activation kernel (conv-as-im2col and FC layers)
# -----------------------------------------------------------------------------
def _mm_kernel(x_ref, w_ref, b_ref, o_ref, *, activation):
    k = pl.program_id(2)

    @pl.when(k == 0)
    def _():
        o_ref[...] = jnp.zeros_like(o_ref)

    # bf16 operands, f32 accumulation directly in the resident output block.
    o_ref[...] += jnp.dot(x_ref[...], w_ref[...],
                          preferred_element_type=jnp.float32)

    @pl.when(k == pl.num_programs(2) - 1)
    def _():
        r = o_ref[...] + b_ref[...]          # (tm, tn) + (1, tn) broadcast
        if activation == "relu":
            r = jnp.maximum(r, 0.0)
        o_ref[...] = r


def _choose_tiles(M, K, N):
    mp8 = _round_up(M, 8)
    if mp8 > 256:
        tm, Mp = 256, _round_up(M, 256)
    else:
        tm, Mp = mp8, mp8
    tk = 512 if K > 512 else _round_up(K, 128)
    Kp = _round_up(K, tk)
    Np = _round_up(N, 128)
    tn = 128
    for cand in (512, 384, 256):
        if Np % cand == 0:
            tn = cand
            break
    return tm, tk, tn, Mp, Kp, Np


def matmul_bias_act(x, w, b, activation="none"):
    """x: (M, K), w: (K, N), b: (N,) -> (M, N) f32. Operands run as bf16."""
    M, K = x.shape
    K2, N = w.shape
    assert K == K2
    tm, tk, tn, Mp, Kp, Np = _choose_tiles(M, K, N)

    x = x.astype(jnp.bfloat16)
    w = w.astype(jnp.bfloat16)
    if (Mp, Kp) != (M, K):
        x = jnp.pad(x, ((0, Mp - M), (0, Kp - K)))
    if (Kp, Np) != (K, N):
        w = jnp.pad(w, ((0, Kp - K), (0, Np - N)))
    b2 = b.astype(jnp.float32)
    if Np != N:
        b2 = jnp.pad(b2, ((0, Np - N),))
    b2 = b2.reshape(1, Np)

    grid = (Mp // tm, Np // tn, Kp // tk)

    # When M is tiny (FC layers) the layer is a pure weight-streaming GEMV:
    # ask for deeper buffering on the weight stream so DMA stays ahead.
    w_spec = pl.BlockSpec((tk, tn), lambda i, j, k: (k, j))
    if Mp <= 64 and grid[2] >= 2:
        try:
            w_spec = pl.BlockSpec((tk, tn), lambda i, j, k: (k, j),
                                  pipeline_mode=pl.Buffered(3))
        except TypeError:  # older jax without pipeline_mode kwarg
            pass

    kernel = functools.partial(_mm_kernel, activation=activation)
    out = pl.pallas_call(
        kernel,
        out_shape=jax.ShapeDtypeStruct((Mp, Np), jnp.float32),
        grid_spec=pltpu.PrefetchScalarGridSpec(
            num_scalar_prefetch=0,
            grid=grid,
            in_specs=[
                pl.BlockSpec((tm, tk), lambda i, j, k: (i, k)),
                w_spec,
                pl.BlockSpec((1, tn), lambda i, j, k: (0, j)),
            ],
            out_specs=pl.BlockSpec((tm, tn), lambda i, j, k: (i, j)),
        ),
        compiler_params=pltpu.CompilerParams(
            dimension_semantics=("parallel", "parallel", "arbitrary"),
            vmem_limit_bytes=32 * 1024 * 1024,
        ),
    )(x, w, b2)
    if (Mp, Np) != (M, N):
        out = out[:M, :N]
    return out


# -----------------------------------------------------------------------------
# MaxPool2d(kernel_size=3, stride=2) — window max reduction in Pallas
# -----------------------------------------------------------------------------
def _maxpool_kernel(w_ref, o_ref, *, kk):
    r = w_ref[0, 0]
    for i in range(1, kk):
        r = jnp.maximum(r, w_ref[0, i])
    o_ref[0] = r


def maxpool2d(x, ksize=3, stride=2):
    """x: (N, H, W, C) -> (N, OH, OW, C) bf16, 'valid' pooling."""
    # bf16 here is exact for the downstream bf16 matmuls: round-to-bf16 is
    # monotone, so max(bf16(a), bf16(b)) == bf16(max(a, b)).
    x = x.astype(jnp.bfloat16)
    Nb, H, W, C = x.shape
    OH = (H - ksize) // stride + 1
    OW = (W - ksize) // stride + 1
    wins = []
    for kh in range(ksize):
        for kw in range(ksize):
            wins.append(
                x[:, kh:kh + stride * (OH - 1) + 1:stride,
                     kw:kw + stride * (OW - 1) + 1:stride, :])
    kk = ksize * ksize
    # (N, kk, OH*OW, C): rows map to sublanes, channels to lanes (dense).
    wins = jnp.stack(wins, axis=1).reshape(Nb, kk, OH * OW, C)
    # TODO(synk): the kk-window stack still amplifies pool HBM traffic ~kk x;
    # a fully fused pool reading the conv output in place needs overlapping /
    # strided BlockSpecs and is left as follow-up.
    out = pl.pallas_call(
        functools.partial(_maxpool_kernel, kk=kk),
        out_shape=jax.ShapeDtypeStruct((Nb, OH * OW, C), x.dtype),
        grid=(Nb,),
        in_specs=[pl.BlockSpec((1, kk, OH * OW, C), lambda n: (n, 0, 0, 0))],
        out_specs=pl.BlockSpec((1, OH * OW, C), lambda n: (n, 0, 0)),
        compiler_params=pltpu.CompilerParams(
            dimension_semantics=("parallel",),
            vmem_limit_bytes=32 * 1024 * 1024),
    )(wins)
    return out.reshape(Nb, OH, OW, C)


# -----------------------------------------------------------------------------
# Row softmax (final classifier head) as a tiny Pallas kernel
# -----------------------------------------------------------------------------
def _softmax_kernel(x_ref, o_ref):
    x = x_ref[...]
    m = jnp.max(x, axis=-1, keepdims=True)
    e = jnp.exp(x - m)
    o_ref[...] = e / jnp.sum(e, axis=-1, keepdims=True)


def softmax_rows(x):
    return pl.pallas_call(
        _softmax_kernel,
        out_shape=jax.ShapeDtypeStruct(x.shape, jnp.float32),
    )(x.astype(jnp.float32))


# -----------------------------------------------------------------------------
# Conv2d = im2col (bf16 glue) + Pallas fused matmul/bias/ReLU
# -----------------------------------------------------------------------------
def _im2col(x, KH, KW, stride, padding):
    if padding:
        x = jnp.pad(x, ((0, 0), (padding, padding), (padding, padding), (0, 0)))
    Nb, H, W, C = x.shape
    OH = (H - KH) // stride + 1
    OW = (W - KW) // stride + 1
    cols = []
    for kh in range(KH):
        for kw in range(KW):
            cols.append(
                x[:, kh:kh + stride * (OH - 1) + 1:stride,
                     kw:kw + stride * (OW - 1) + 1:stride, :])
    patches = jnp.concatenate(cols, axis=-1)  # (N, OH, OW, KH*KW*C)
    return patches, OH, OW


def conv2d_relu(x, w, b, stride=1, padding=0):
    KH, KW, Cin, Cout = w.shape
    Nb = x.shape[0]
    x = x.astype(jnp.bfloat16)  # im2col patches materialized in bf16
    # TODO(synk): moving patch extraction inside the kernel (overlapping /
    # Element-indexed input BlockSpec) would remove the remaining im2col HBM
    # amplification entirely; kept as plain-JAX glue here.
    patches, OH, OW = _im2col(x, KH, KW, stride, padding)
    pm = patches.reshape(Nb * OH * OW, KH * KW * Cin)
    wm = w.reshape(KH * KW * Cin, Cout)
    out = matmul_bias_act(pm, wm, b, activation="relu")
    return out.reshape(Nb, OH, OW, Cout)


# -----------------------------------------------------------------------------
# AlexNet model (deterministic synthetic parameters)
# -----------------------------------------------------------------------------
def _conv_out(s, k, st, p=0):
    return (s + 2 * p - k) // st + 1


class AlexNetPallas:
    def __init__(self, in_channels, num_classes, H, W, key):
        def conv_param(key, kh, kw, cin, cout):
            kw_, kb_ = jax.random.split(key)
            fan_in = kh * kw * cin
            w = jax.random.normal(kw_, (kh, kw, cin, cout), jnp.float32)
            w = (w / jnp.sqrt(jnp.float32(fan_in))).astype(jnp.bfloat16)
            b = 0.01 * jax.random.normal(kb_, (cout,), jnp.float32)
            return w, b

        def fc_param(key, fin, fout):
            kw_, kb_ = jax.random.split(key)
            w = jax.random.normal(kw_, (fin, fout), jnp.float32)
            w = (w / jnp.sqrt(jnp.float32(fin))).astype(jnp.bfloat16)
            b = 0.01 * jax.random.normal(kb_, (fout,), jnp.float32)
            return w, b

        ks = jax.random.split(key, 8)
        self.w1, self.b1 = conv_param(ks[0], 11, 11, in_channels, 96)
        self.w2, self.b2 = conv_param(ks[1], 5, 5, 96, 256)
        self.w3, self.b3 = conv_param(ks[2], 3, 3, 256, 384)
        self.w4, self.b4 = conv_param(ks[3], 3, 3, 384, 384)
        self.w5, self.b5 = conv_param(ks[4], 3, 3, 384, 256)

        # Trace spatial sizes to get the true flatten width.
        s = _conv_out(H, 11, 4)              # conv1
        s = _conv_out(s, 3, 2)               # pool
        s = _conv_out(s, 5, 1, 2)            # conv2
        s = _conv_out(s, 3, 2)               # pool
        s = _conv_out(s, 3, 1)               # conv3
        s = _conv_out(s, 3, 1)               # conv4
        s = _conv_out(s, 3, 1)               # conv5
        s = _conv_out(s, 3, 2)               # pool
        # TODO(synk): reference declares fc1 in_features=227*227*3, which can
        # never equal the actual flattened size; fc1 is sized to the real value.
        fc1_in = 256 * s * s

        self.fc1_w, self.fc1_b = fc_param(ks[5], fc1_in, 4096)
        self.fc2_w, self.fc2_b = fc_param(ks[6], 4096, 4096)
        # TODO(synk): reference's `nn.Softmax(4096, 1000)` is invalid torch;
        # interpreted as Linear(4096, num_classes) followed by softmax(dim=1).
        self.out_w, self.out_b = fc_param(ks[7], 4096, num_classes)

    def __call__(self, x_nchw):
        x = jnp.transpose(x_nchw, (0, 2, 3, 1)).astype(jnp.float32)  # NCHW->NHWC
        x = conv2d_relu(x, self.w1, self.b1, stride=4, padding=0)
        x = maxpool2d(x)
        x = conv2d_relu(x, self.w2, self.b2, stride=1, padding=2)
        x = maxpool2d(x)
        x = conv2d_relu(x, self.w3, self.b3)
        x = conv2d_relu(x, self.w4, self.b4)
        x = conv2d_relu(x, self.w5, self.b5)
        x = maxpool2d(x)
        x = x.reshape(x.shape[0], -1)
        x = matmul_bias_act(x, self.fc1_w, self.fc1_b, activation="relu")
        # TODO(synk): F.dropout(p=0.4, training=self.training) — eval mode
        # (identity); PyTorch-RNG-exact dropout has no Pallas equivalent.
        x = matmul_bias_act(x, self.fc2_w, self.fc2_b, activation="relu")
        # TODO(synk): second dropout likewise identity in eval mode.
        logits = matmul_bias_act(x, self.out_w, self.out_b, activation="none")
        x = softmax_rows(logits)
        # TODO(synk): reference forward() has no return; we return the softmax.
        return x


if __name__ == "__main__":
    key = jax.random.PRNGKey(0)
    kx, kp = jax.random.split(key)

    in_channels = 3
    num_classes = 1000
    batch = 2
    # Smallest spatial size for which this (padding-free conv3..conv5) stack
    # produces valid shapes through the final 3x3/stride-2 max-pool.
    H = W = 163

    x = jax.random.normal(kx, (batch, in_channels, H, W), jnp.float32)  # NCHW
    model = AlexNetPallas(in_channels, num_classes, H, W, kp)

    out = model(x)
    out = jax.block_until_ready(out)
    assert out.shape == (batch, num_classes)
    assert bool(jnp.all(jnp.isfinite(out)))
    print("KERNEL_OK")
</pallas_src>

<mosaic_0001>
module attributes {stable_mosaic.version = 11 : i64} {
  func.func @_mm_kernel(%arg0: i32, %arg1: i32, %arg2: i32, %arg3: memref<256x384xbf16, #tpu.memory_space<vmem>>, %arg4: memref<384x128xbf16, #tpu.memory_space<vmem>>, %arg5: memref<1x128xf32, #tpu.memory_space<vmem>>, %arg6: memref<256x128xf32, #tpu.memory_space<vmem>>) attributes {dimension_semantics = [#tpu.dimension_semantics<parallel>, #tpu.dimension_semantics<parallel>, #tpu.dimension_semantics<arbitrary>], iteration_bounds = array<i64: 12, 1, 1>, scalar_prefetch = 0 : i64, scratch_operands = 0 : i64, tpu.core_type = #tpu.core_type<tc>, window_params = [{transform_indices = @transform_0, window_bounds = array<i64: 256, 384>}, {transform_indices = @transform_1, window_bounds = array<i64: 384, 128>}, {transform_indices = @transform_2, window_bounds = array<i64: 1, 128>}, {transform_indices = @transform_3, window_bounds = array<i64: 256, 128>}]} {
    %c0_i32 = arith.constant 0 : i32
    %0 = arith.cmpi eq, %arg2, %c0_i32 : i32
    %1 = arith.extui %0 : i1 to i32
    %c0_i32_0 = arith.constant 0 : i32
    %2 = arith.cmpi ne, %1, %c0_i32_0 : i32
    scf.if %2 {
      %cst_10 = arith.constant 0.000000e+00 : f32
      %12 = vector.broadcast %cst_10 : f32 to vector<256x128xf32>
      %c0_11 = arith.constant 0 : index
      %c0_12 = arith.constant 0 : index
      %13 = vector.load %arg6[%c0_11, %c0_12] : memref<256x128xf32, #tpu.memory_space<vmem>>, vector<256x128xf32>
      tpu.vector_store %arg6[%c0_11, %c0_12], %12 {strides = array<i32>} : memref<256x128xf32, #tpu.memory_space<vmem>>, vector<256x128xf32>,
    } else {
    }
    %c0 = arith.constant 0 : index
    %c0_1 = arith.constant 0 : index
    %3 = vector.load %arg6[%c0, %c0_1] : memref<256x128xf32, #tpu.memory_space<vmem>>, vector<256x128xf32>
    %c0_2 = arith.constant 0 : index
    %c0_3 = arith.constant 0 : index
    %4 = vector.load %arg3[%c0_2, %c0_3] : memref<256x384xbf16, #tpu.memory_space<vmem>>, vector<256x384xbf16>
    %c0_4 = arith.constant 0 : index
    %c0_5 = arith.constant 0 : index
    %5 = vector.load %arg4[%c0_4, %c0_5] : memref<384x128xbf16, #tpu.memory_space<vmem>>, vector<384x128xbf16>
    %cst = arith.constant dense<0.000000e+00> : vector<256x128xf32>
    %6 = tpu.matmul %4, %5, %cst {dimension_numbers = #tpu.dot_dimension_numbers<[1], [0], [0], [1], [0, 0, 1, 1], [], []>} : vector<256x384xbf16>, vector<384x128xbf16>, vector<256x128xf32> -> vector<256x128xf32>
    %7 = arith.addf %3, %6 : vector<256x128xf32>
    %c0_6 = arith.constant 0 : index
    %c0_7 = arith.constant 0 : index
    %8 = vector.load %arg6[%c0_6, %c0_7] : memref<256x128xf32, #tpu.memory_space<vmem>>, vector<256x128xf32>
    tpu.vector_store %arg6[%c0_6, %c0_7], %7 {strides = array<i32>} : memref<256x128xf32, #tpu.memory_space<vmem>>, vector<256x128xf32>,
    %c0_i32_8 = arith.constant 0 : i32
    %9 = arith.cmpi eq, %arg2, %c0_i32_8 : i32
    %10 = arith.extui %9 : i1 to i32
    %c0_i32_9 = arith.constant 0 : i32
    %11 = arith.cmpi ne, %10, %c0_i32_9 : i32
    scf.if %11 {
      %c0_10 = arith.constant 0 : index
      %c0_11 = arith.constant 0 : index
      %12 = vector.load %arg6[%c0_10, %c0_11] : memref<256x128xf32, #tpu.memory_space<vmem>>, vector<256x128xf32>
      %c0_12 = arith.constant 0 : index
      %c0_13 = arith.constant 0 : index
      %13 = vector.load %arg5[%c0_12, %c0_13] : memref<1x128xf32, #tpu.memory_space<vmem>>, vector<1x128xf32>
      %14 = vector.broadcast %13 : vector<1x128xf32> to vector<256x128xf32>
      %15 = arith.addf %12, %14 : vector<256x128xf32>
      %cst_14 = arith.constant 0.000000e+00 : f32
      %16 = vector.broadcast %cst_14 : f32 to vector<256x128xf32>
      %17 = arith.maximumf %15, %16 : vector<256x128xf32>
      %c0_15 = arith.constant 0 : index
      %c0_16 = arith.constant 0 : index
      %18 = vector.load %arg6[%c0_15, %c0_16] : memref<256x128xf32, #tpu.memory_space<vmem>>, vector<256x128xf32>
      tpu.vector_store %arg6[%c0_15, %c0_16], %17 {strides = array<i32>} : memref<256x128xf32, #tpu.memory_space<vmem>>, vector<256x128xf32>,
    } else {
    }
    return
  }
  func.func @transform_0(%arg0: i32, %arg1: i32, %arg2: i32) -> (i32, i32) {
    %c0_i32 = arith.constant 0 : i32
    return %arg0, %arg2 : i32, i32
  }
  func.func @transform_1(%arg0: i32, %arg1: i32, %arg2: i32) -> (i32, i32) {
    %c0_i32 = arith.constant 0 : i32
    return %arg2, %arg1 : i32, i32
  }
  func.func @transform_2(%arg0: i32, %arg1: i32, %arg2: i32) -> (i32, i32) {
    %c0_i32 = arith.constant 0 : i32
    %c0_i32_0 = arith.constant 0 : i32
    return %c0_i32, %arg1 : i32, i32
  }
  func.func @transform_3(%arg0: i32, %arg1: i32, %arg2: i32) -> (i32, i32) {
    %c0_i32 = arith.constant 0 : i32
    return %arg0, %arg1 : i32, i32
  }
}

</mosaic_0001>

<bundles_post_ra>
// kernel: tpu_custom_call.1
= control target key start
LH: loop header
LB: loop body
LE: loop exit
PB: predicated region body
PF: predicated region fallthrough
CT: control target
= control target key end

     0   :  { %8 = vsyncpa [#allocation3], 0  ;;  %s2570_s0 = inlined_call_operand.hbm [shape: bf16[3072,384], index: 0, kind: input, shape index: {}]   ;;  %s2571_s1 = inlined_call_operand.hbm [shape: bf16[384,128], index: 1, kind: input, shape index: {}]   ;;  %s2572_s2 = inlined_call_operand.hbm [shape: f32[1,128], index: 2, kind: input, shape index: {}]   ;;  %s2573_s3 = inlined_call_operand.hbm [shape: f32[3072,128], index: 3, kind: output, shape index: {}]  }
   0x1   :  { %10 = vsyncpa [#allocation3 + $0x1], 0 }
   0x2   :  { %11 = vsyncpa [#allocation6], 0 }
   0x3   :  { %12 = vsyncpa [#allocation4], 0 }
   0x4   :  { %14 = vsyncpa [#allocation4 + $0x1], 0  ;;  %s2175_s12 = smov 0   ;;  %s2177_s13 = smov 0  }
   0x5   :  { %s2179_s14 = smov 0   ;;  %s2181_s15 = smov 0  }
   0x6   :  { %s2183_s16 = smov 0   ;;  %s2185_s17 = smov 0  }
   0x7 LB: > { %s1498_s18 = sadd.s32 4294967295, %s2143_s17   ;;  %s1499_s19 = sadd.s32 4294967294, %s2143_s17   ;;  %s2143_s17 = sphi %s2185_s17, %s20_s17   ;;  %s2139_s16 = sphi %s2183_s16, %s2595_s16   ;;  %s2135_s15 = sphi %s2181_s15, %s2594_s15   ;;  %s2131_s14 = sphi %s2179_s14, %s2593_s14   ;;  %s2127_s13 = sphi %s2177_s13, %s2592_s13   ;;  %s2123_s12 = sphi %s2175_s12, %s2591_s12  }
   0x8   : > { %p61_p0 = scmp.ne.s32.totalorder %s2127_s13, %s2123_s12  ;;  %p2209_p1 = scmp.eq.s32.totalorder %s1498_s18, 0 }
   0x9   : > { %p2213_p2 = scmp.eq.s32.totalorder %s1498_s18, 11  ;;  %p147_p3 = scmp.eq.s32.totalorder %s1499_s19, 11 }
   0xa   : > { %s2578_s20 = scalar_select %p2209_p1, 1, 0 }
   0xb   : > { %s2579_s21 = scalar_select %p2213_p2, 1, 0 }
   0xc   : > { %p2219_p4 = por %p2209_p1, %p61_p0  ;;  %p1500_p5 = scmp.ge.s32.totalorder %s2143_s17, 1 }
   0xd   : > { %p2224_p6 = por %p147_p3, %p61_p0  ;;  %p154_p7 = scmp.lt.s32.totalorder %s2143_s17, 13 }
   0xe   : > { %s2580_s22 = scalar_select %p2219_p4, 1, 0 }
   0xf   : > { %s2581_s23 = scalar_select %p2224_p6, 1, 0 }
  0x10   : > { %p2229_p8 = pnand %p1500_p5, %p154_p7  ;;  %s2145_s25 = smov [#allocation5]  }
  0x11   : > { %s170_s26 = sshll.u32 %s2145_s25, 4  ;;  %s2146_s28 = smov [#allocation7]   ;;  %s171_s26 = int_to_ptr.vmem [resolvable:$true] %s170_s26 }
  0x12   : > { %s2582_s24 = scalar_select %p2229_p8, 1, 0 }
  0x13   : > { %p1805_p9 = pneg %p2229_p8  ;;  %s186_s29 = sshll.u32 %s2146_s28, 4  ;;  %s2241_s29 = int_to_ptr.vmem [resolvable:$true] %s186_s29 }
  0x14   : > { %s1971_s5 = scalar_lea.hbm %s2571_s1, 3072 }
  0x15   : > { %p2237_p10 = pnand %p1805_p9, %p2209_p1  ;;  %p1972_p11 = scmp.ne.s32.totalorder %s2571_s1, %s1971_s5 }
  0x16   : > { %p1978_p3 = scmp.lt.u32.totalorder %s1971_s5, %s2571_s1 }
  0x17   : > { %p1973_p12 = pneg %p2237_p10 }
  0x19   : > { %p1974_p13 = pnand %p1973_p12, %p1972_p11 }
  0x1b   : > { %p1975_p0 = pneg %p1974_p13 }
  0x1d   : > { %p1980_p5 = pnand %p1978_p3, %p1975_p0 }
  0x1f   : > { %1983 = shalt.err (!%p1980_p5)
}
  0x20   : > { %s1984_s10 = scalar_lea.vmem %s171_s26, 3072  ;;  %p1992_p1 = scmp.lt.s32.totalorder %s171_s26, %s171_s26 }
  0x21   : > { %p1985_p7 = scmp.ne.s32.totalorder %s171_s26, %s1984_s10  ;;  %p1993_p4 = scmp.lt.s32.totalorder %s1984_s10, %s1984_s10 }
  0x23   : > { %p1987_p9 = pnand %p1985_p7, %p1973_p12  ;;  %p1994_p8 = por %p1993_p4, %p1992_p1 }
  0x25   : > { %p1988_p6 = pneg %p1987_p9 }
  0x27   : > { %p1995_p2 = pnand %p1994_p8, %p1988_p6 }
  0x29   : > { %1998 = shalt.err (!%p1995_p2)
}
  0x2a   : > { %s2147_s11 = smov 64   ;;  %s2148_s18 = smov 4  }
  0x2b   : > { %1808 = dma.hbm_to_vmem [thread:$0]  (!%p2237_p10), %s2571_s1, 3072, %s171_s26, [#allocation6], %s2147_s11, %s2147_s11, %s2148_s18  }
  0x2c   : > { %s1999_s4 = scalar_lea.hbm %s2572_s2, 16 }
  0x2d   : > { %p2000_p11 = scmp.ne.s32.totalorder %s2572_s2, %s1999_s4  ;;  %p2006_p4 = scmp.lt.u32.totalorder %s1999_s4, %s2572_s2 }
  0x2f   : > { %p2002_p1 = pnand %p2000_p11, %p1973_p12 }
  0x31   : > { %p2003_p2 = pneg %p2002_p1 }
  0x33   : > { %p2008_p6 = pnand %p2006_p4, %p2003_p2 }
  0x35   : > { %2011 = shalt.err (!%p2008_p6)
}
  0x36   : > { %s2012_s26 = scalar_lea.vmem %s2241_s29, 16  ;;  %s2019_s9 = scalar_lea.vmem %s2241_s29, 32 }
  0x37   : > { %p2013_p8 = scmp.ne.s32.totalorder %s2241_s29, %s2012_s26  ;;  %p2020_p3 = scmp.lt.s32.totalorder %s2241_s29, %s2241_s29 }
  0x38   : > { %p2021_p5 = scmp.lt.s32.totalorder %s2019_s9, %s2012_s26 }
  0x39   : > { %p2015_p13 = pnand %p2013_p8, %p1973_p12 }
  0x3a   : > { %p2022_p7 = por %p2021_p5, %p2020_p3 }
  0x3b   : > { %p2016_p0 = pneg %p2015_p13 }
  0x3d   : > { %p2023_p9 = pnand %p2022_p7, %p2016_p0 }
  0x3f   : > { %2026 = shalt.err (!%p2023_p9)
}
  0x40   : > { %1811 = dma.hbm_to_vmem [thread:$0]  (!%p2237_p10), %s2572_s2, 16, %s2241_s29, [#allocation6]  }
  0x41   : > { %s39_s18 = sadd.s32 1, %s2139_s16  ;;  %s48_s19 = sadd.s32 1, %s2131_s14 }
  0x42   : > { %p41_p12 = scmp.ge.s32.totalorder %s39_s18, 12  ;;  %p55_p11 = scmp.ne.s32.totalorder %s2131_s14, %s2127_s13 }
  0x43   : > { %p56_p1 = scmp.eq.s32.totalorder %s2143_s17, 0  ;;  %p1822_p2 = scmp.lt.s32.totalorder %s2143_s17, 12 }
  0x44   : > { %s2597_s18 = smov (%p41_p12, %s39_s18), 0  ;;  %p2584_p6 = scmp.ne.s32.totalorder %s2579_s21, 0 }
  0x45   : > { %p57_p4 = por %p56_p1, %p55_p11  ;;  %s43_s25 = ssub.s32 %s2139_s16, %s2597_s18 }
  0x46   : > { %p2301_p8 = por %p2584_p6, %p55_p11  ;;  %s197_s28 = sand.u32 1, %s2131_s14  }
  0x47   : > { %p46_p13 = scmp.eq.s32.totalorder %s43_s25, 0  ;;  %s1790_s29 = smul.u32 384, %s197_s28 }
  0x48   : > { %p2308_p10 = pnand %p1822_p2, %p57_p4  ;;  %s1791_s5 = smul.u32 6144, %s2139_s16 }
  0x49   : > { %s2313_s4 = scalar_select %p46_p13, %s2131_s14, %s48_s19  }
  0x4a   : > { %s201_s6 = scalar_lea.vmem [#allocation2], %s1790_s29  ;;  %s2319_s26 = scalar_lea.hbm %s2570_s0, %s1791_s5 }
  0x4b   : > { %s211_s7 = sshll.u32 %s201_s6, 4  ;;  %s2323_s9 = scalar_lea.sflag [#allocation3], %s197_s28  ;;  %s2321_s7 = int_to_ptr.vmem [resolvable:$true] %s211_s7 }
  0x4c   : > { %s2027_s10 = scalar_lea.hbm %s2319_s26, 6144  ;;  %p2029_p3 = pneg %p2308_p10 }
  0x4d   : > { %p2028_p0 = scmp.ne.s32.totalorder %s2319_s26, %s2027_s10  ;;  %s2032_s25 = scalar_lea.hbm %s2570_s0, 73728 }
  0x4e   : > { %p2033_p9 = scmp.lt.u32.totalorder %s2319_s26, %s2570_s0  ;;  %p2034_p12 = scmp.lt.u32.totalorder %s2032_s25, %s2027_s10 }
  0x4f   : > { %p2030_p5 = pnand %p2029_p3, %p2028_p0  ;;  %p2036_p1 = scmp.lt.u32.totalorder %s2027_s10, %s2319_s26 }
  0x50   : > { %p2035_p11 = por %p2034_p12, %p2033_p9 }
  0x51   : > { %p2031_p7 = pneg %p2030_p5 }
  0x52   : > { %p2037_p2 = por %p2036_p1, %p2035_p11 }
  0x54   : > { %p2038_p4 = pnand %p2037_p2, %p2031_p7 }
  0x56   : > { %2041 = shalt.err (!%p2038_p4)
}
  0x57   : > { %s2042_s28 = scalar_lea.vmem %s2321_s7, 6144  ;;  %s2149_s6 = smov [#allocation2]  }
  0x58   : > { %p2043_p6 = scmp.ne.s32.totalorder %s2321_s7, %s2042_s28  ;;  %s2047_s21 = sshll.u32 %s2149_s6, 4  ;;  %s2048_s21 = int_to_ptr.vmem [resolvable:$false] %s2047_s21 }
  0x59   : > { %s2049_s8 = scalar_lea.vmem %s2048_s21, 12288  ;;  %p2050_p5 = scmp.lt.s32.totalorder %s2321_s7, %s2048_s21 }
  0x5a   : > { %p2045_p13 = pnand %p2043_p6, %p2029_p3  ;;  %p2051_p9 = scmp.lt.s32.totalorder %s2049_s8, %s2042_s28 }
  0x5c   : > { %p2046_p0 = pneg %p2045_p13  ;;  %p2052_p12 = por %p2051_p9, %p2050_p5 }
  0x5e   : > { %p2053_p11 = pnand %p2052_p12, %p2046_p0 }
  0x60   : > { %2056 = shalt.err (!%p2053_p11)
}
  0x61   : > { %s2150_s10 = smov 192   ;;  %s2151_s11 = smov 12  }
  0x62   : > { %1815 = dma.hbm_to_vmem [thread:$0]  (!%p2308_p10), %s2319_s26, 6144, %s2321_s7, %s2323_s9, %s2150_s10, %s2150_s10, %s2151_s11  }
  0x63   : > { %p2587_p3 = scmp.ne.s32.totalorder %s2582_s24, 0 }
  0x64   : > { %s2354_s19 = sand.u32 (!%p2587_p3), 1, %s2127_s13   ;;  %p2588_p7 = scmp.ne.s32.totalorder (!%p2587_p3), %s2580_s22, 0 }
  0x65   : > { %223 = sbr.rel (%p2587_p3) target bundleno = 471 (0x1d7), region = 32  ;;  %s226_s29 = scalar_lea.sflag (!%p2587_p3), [#allocation3], %s2354_s19 }
  0x66   : > { %s1792_s25 = smul.u32 (!%p2587_p3), 384, %s2354_s19 }
  0x68   : > { %s2358_s5 = scalar_lea.vmem (!%p2587_p3), [#allocation2], %s1792_s25 }
  0x6c   : > { %2110 = dma.done.wait (%p2588_p7), %s226_s29, 6144  }
  0x6d   : > { %2112 = vsyncadd (%p2588_p7), %s226_s29, 4294961152  ;;  %p2589_p10 = scmp.ne.s32.totalorder %s2578_s20, 0 }
  0x6f   : > { %2114 = dma.done.wait (%p2589_p10), [#allocation6], 3088  }
  0x70   : > { %2116 = vsyncadd (%p2589_p10), [#allocation6], 4294964208  ;;  %v1883_v0 = vld [vmem:[#allocation5 + $0x40] sm:$0xff]   ;;  %v1885_v2 = vld [vmem:[#allocation5 + $0x48] sm:$0xff]   ;;  %s1510_s20 = sshll.u32 %s2354_s19, 8  ;;  %s1589_s24 = sshll.u32 %s2135_s15, 12 }
  0x71   : > { %v1884_v1 = vld [vmem:[#allocation5] sm:$0xff]   ;;  %1590 = vmatprep.subr.bf16.mxu0 %v1883_v0  ;;  %1774 = vmatprep.subr.bf16.mxu1 %v1883_v0  ;;  %v1886_v3 = vld [vmem:[#allocation5 + $0x8] sm:$0xff]   ;;  %v1887_v4 = vld [vmem:[#allocation5 + $0x50] sm:$0xff]   ;;  %s2439_s22 = scalar_lea.vmem [#allocation8], %s1510_s20  ;;  %s2517_s9 = scalar_lea.hbm %s2573_s3, %s1589_s24 }
  0x72   : > { %1591 = vmatpush3.bf16.msra.mxu0 %v1884_v1  ;;  %1782 = vmatpush3.bf16.msra.mxu1 %v1884_v1  ;;  %v1888_v5 = vld [vmem:[#allocation5 + $0x10] sm:$0xff]   ;;  %v1889_v6 = vld [vmem:[#allocation5 + $0x58] sm:$0xff]   ;;  %v1891_v8 = vld [vmem:[#allocation5 + $0x60] sm:$0xff]   ;;  %s1384_s30 = sshll.u32 %s2439_s22, 4  ;;  %s1370_s15 = scalar_lea.sflag [#allocation4], %s2354_s19  ;;  %s2519_s30 = int_to_ptr.vmem [resolvable:$true] %s1384_s30 }
  0x73   : > { %1592 = vmatprep.subr.bf16.mxu0 %v1885_v2  ;;  %1775 = vmatprep.subr.bf16.mxu1 %v1885_v2  ;;  %v1890_v7 = vld [vmem:[#allocation5 + $0x18] sm:$0xff]   ;;  %v1892_v9 = vld [vmem:[#allocation5 + $0x20] sm:$0xff]   ;;  %v1893_v10 = vld [vmem:[#allocation5 + $0x68] sm:$0xff]   ;;  %s2057_s28 = scalar_lea.vmem %s2519_s30, 4096  ;;  %s2152_s6 = smov [#allocation8]  }
  0x74   : > { %v1901_v11 = vld [vmem:[%s2358_s5 + $0x4] ss:$12 sps:$4 sm:$0xff]   ;;  %v1894_v13 = vld [vmem:[#allocation5 + $0x28] sm:$0xff]   ;;  %v1897_v16 = vld [vmem:[#allocation5 + $0x78] sm:$0xff]   ;;  %p2058_p1 = scmp.ne.s32.totalorder %s2519_s30, %s2057_s28  ;;  %s2061_s21 = sshll.u32 %s2152_s6, 4  ;;  %s2062_s21 = int_to_ptr.vmem [resolvable:$false] %s2061_s21 }
  0x75   : > { %v1904_v12 = vld [vmem:[%s2358_s5 + $0x124] ss:$12 sps:$4 sm:$0xff]   ;;  %877 = vmatprep.mubr.bf16.mxu0 %v1901_v11  ;;  %v1898_v17 = vld [vmem:[#allocation5 + $0x38] sm:$0xff]   ;;  %v1899_v19 = vld [vmem:[%s2358_s5] ss:$12 sps:$4 sm:$0xff]   ;;  %s2063_s8 = scalar_lea.vmem %s2062_s21, 8192  ;;  %p2064_p6 = scmp.lt.s32.totalorder %s2519_s30, %s2062_s21 }
  0x76   : > { %1593 = vmatpush3.bf16.msra.mxu0 %v1886_v3  ;;  %1783 = vmatpush3.bf16.msra.mxu1 %v1886_v3  ;;  %v1895_v14 = vld [vmem:[#allocation5 + $0x70] sm:$0xff]   ;;  %v1905_v18 = vld [vmem:[#allocation5 + $0x80] sm:$0xff]   ;;  %v1907_v21 = vld [vmem:[%s2358_s5 + $0x1c] ss:$12 sps:$4 sm:$0xff]   ;;  %p2059_p2 = pnand %p2058_p1, %p2301_p8  ;;  %p2065_p13 = scmp.lt.s32.totalorder %s2063_s8, %s2057_s28 }
  0x77   : > { %1594 = vmatprep.subr.bf16.mxu0 %v1887_v4  ;;  %1776 = vmatprep.subr.bf16.mxu1 %v1887_v4  ;;  %v1896_v15 = vld [vmem:[#allocation5 + $0x30] sm:$0xff]   ;;  %v1902_v20 = vld [vmem:[%s2358_s5 + $0x120] ss:$12 sps:$4 sm:$0xff]   ;;  %v1909_v23 = vld [vmem:[%s2358_s5 + $0x13c] ss:$12 sps:$4 sm:$0xff]  }
  0x78   : > { %973 = vmatprep.mubr.bf16.mxu1 %v1904_v12  ;;  %v1906_v22 = vld [vmem:[#allocation5 + $0x88] sm:$0xff]   ;;  %v1911_v24 = vld [vmem:[%s2358_s5 + $0x18] ss:$12 sps:$4 sm:$0xff]   ;;  %v1913_v25 = vld [vmem:[#allocation5 + $0x90] sm:$0xff]   ;;  %p2060_p4 = pneg %p2059_p2  ;;  %p2066_p0 = por %p2065_p13, %p2064_p6 }
  0x79   : > { %v1912_v26 = vld [vmem:[%s2358_s5 + $0x138] ss:$12 sps:$4 sm:$0xff]   ;;  %v1915_v28 = vld [vmem:[%s2358_s5 + $0x34] ss:$12 sps:$4 sm:$0xff]   ;;  %v1919_v31 = vld [vmem:[%s2358_s5 + $0x30] ss:$12 sps:$4 sm:$0xff]  }
  0x7a   : > { %1595 = vmatpush3.bf16.msra.mxu0 %v1888_v5  ;;  %1784 = vmatpush3.bf16.msra.mxu1 %v1888_v5  ;;  %v1914_v27 = vld [vmem:[#allocation5 + $0x98] sm:$0xff]   ;;  %v1917_v29 = vld [vmem:[%s2358_s5 + $0x154] ss:$12 sps:$4 sm:$0xff]   ;;  %v1922_v33 = vld [vmem:[#allocation5 + $0xa8] sm:$0xff]   ;;  %p2067_p5 = pnand %p2066_p0, %p2060_p4 }
  0x7b   : > { %1596 = vmatprep.subr.bf16.mxu0 %v1889_v6  ;;  %1777 = vmatprep.subr.bf16.mxu1 %v1889_v6  ;;  %v1921_v30 = vld [vmem:[#allocation5 + $0xa0] sm:$0xff]   ;;  %v1920_v32 = vld [vmem:[%s2358_s5 + $0x150] ss:$12 sps:$4 sm:$0xff]   ;;  %v1923_v34 = vld [vmem:[%s2358_s5 + $0x4c] ss:$12 sps:$4 sm:$0xff]  }
  0x7c   : > { %v1925_v35 = vld [vmem:[%s2358_s5 + $0x16c] ss:$12 sps:$4 sm:$0xff]   ;;  %v1929_v36 = vld [vmem:[#allocation5 + $0xb0] sm:$0xff]   ;;  %v1936_v44 = vld [vmem:[%s2358_s5 + $0x7c] ss:$12 sps:$4 sm:$0xff]  }
  0x7d   : > { %v1927_v37 = vld [vmem:[%s2358_s5 + $0x48] ss:$12 sps:$4 sm:$0xff]   ;;  %v1931_v39 = vld [vmem:[%s2358_s5 + $0x64] ss:$12 sps:$4 sm:$0xff]   ;;  %v1930_v40 = vld [vmem:[#allocation5 + $0xb8] sm:$0xff]  }
  0x7e   : > { %1597 = vmatpush3.bf16.msra.mxu0 %v1890_v7  ;;  %1785 = vmatpush3.bf16.msra.mxu1 %v1890_v7  ;;  %v1928_v38 = vld [vmem:[%s2358_s5 + $0x168] ss:$12 sps:$4 sm:$0xff]   ;;  %v1934_v42 = vld [vmem:[%s2358_s5 + $0x60] ss:$12 sps:$4 sm:$0xff]   ;;  %v1938_v45 = vld [vmem:[%s2358_s5 + $0x38] ss:$12 sps:$4 sm:$0xff]  }
  0x7f   : > { %1598 = vmatprep.subr.bf16.mxu0 %v1891_v8  ;;  %1778 = vmatprep.subr.bf16.mxu1 %v1891_v8  ;;  %v1933_v41 = vld [vmem:[%s2358_s5 + $0x8] ss:$12 sps:$4 sm:$0xff]   ;;  %v1935_v43 = vld [vmem:[%s2358_s5 + $0x20] ss:$12 sps:$4 sm:$0xff]   ;;  %v1939_v46 = vld [vmem:[%s2358_s5 + $0x78] ss:$12 sps:$4 sm:$0xff]  }
  0x80   : > { %v1940_v47 = vld [vmem:[%s2358_s5 + $0x50] ss:$12 sps:$4 sm:$0xff]   ;;  %v1941_v48 = vld [vmem:[%s2358_s5 + $0x94] ss:$12 sps:$4 sm:$0xff]   ;;  %v1946_v52 = vld [vmem:[%s2358_s5 + $0xac] ss:$12 sps:$4 sm:$0xff]  }
  0x81   : > { %v1943_v49 = vld [vmem:[%s2358_s5 + $0x68] ss:$12 sps:$4 sm:$0xff]   ;;  %v1944_v50 = vld [vmem:[%s2358_s5 + $0x90] ss:$12 sps:$4 sm:$0xff]   ;;  %v1945_v51 = vld [vmem:[%s2358_s5 + $0x80] ss:$12 sps:$4 sm:$0xff]  }
  0x82   : > { %1599 = vmatpush3.bf16.msra.mxu0 %v1892_v9  ;;  %1786 = vmatpush3.bf16.msra.mxu1 %v1892_v9  ;;  %v1948_v53 = vld [vmem:[%s2358_s5 + $0x98] ss:$12 sps:$4 sm:$0xff]   ;;  %v1949_v54 = vld [vmem:[%s2358_s5 + $0xa8] ss:$12 sps:$4 sm:$0xff]   ;;  %v1950_v55 = vld [vmem:[%s2358_s5 + $0xb0] ss:$12 sps:$4 sm:$0xff]  }
  0x83   : > { %1600 = vmatprep.subr.bf16.mxu0 %v1893_v10  ;;  %1779 = vmatprep.subr.bf16.mxu1 %v1893_v10  ;;  %v1951_v56 = vld [vmem:[%s2358_s5 + $0xc4] ss:$12 sps:$4 sm:$0xff]   ;;  %v1953_v57 = vld [vmem:[%s2358_s5 + $0xc8] ss:$12 sps:$4 sm:$0xff]   ;;  %v1954_v58 = vld [vmem:[%s2358_s5 + $0xc0] ss:$12 sps:$4 sm:$0xff]  }
  0x84   : > { %v1955_v59 = vld [vmem:[%s2358_s5 + $0xe0] ss:$12 sps:$4 sm:$0xff]   ;;  %v1956_v60 = vld [vmem:[%s2358_s5 + $0xdc] ss:$12 sps:$4 sm:$0xff]   ;;  %v1958_v61 = vld [vmem:[%s2358_s5 + $0xf8] ss:$12 sps:$4 sm:$0xff]  }
  0x85   : > { %v1959_v62 = vld [vmem:[%s2358_s5 + $0xd8] ss:$12 sps:$4 sm:$0xff]   ;;  %v1960_v63 = vld [vmem:[%s2358_s5 + $0x110] ss:$12 sps:$4 sm:$0xff]   ;;  %v1961_v0 = vld [vmem:[%s2358_s5 + $0xf4] ss:$12 sps:$4 sm:$0xff]  }
  0x86   : > { %1601 = vmatpush3.bf16.msra.mxu0 %v1894_v13  ;;  %1787 = vmatpush3.bf16.msra.mxu1 %v1894_v13  ;;  %v1963_v1 = vld [vmem:[%s2358_s5 + $0x128] ss:$12 sps:$4 sm:$0xff]   ;;  %v1964_v2 = vld [vmem:[%s2358_s5 + $0xf0] ss:$12 sps:$4 sm:$0xff]   ;;  %v1965_v3 = vld [vmem:[%s2358_s5 + $0x140] ss:$12 sps:$4 sm:$0xff]  }
  0x87   : > { %1602 = vmatprep.subr.bf16.mxu0 %v1895_v14  ;;  %1780 = vmatprep.subr.bf16.mxu1 %v1895_v14  ;;  %v1966_v4 = vld [vmem:[%s2358_s5 + $0x10c] ss:$12 sps:$4 sm:$0xff]   ;;  %v1969_v6 = vld [vmem:[%s2358_s5 + $0x108] ss:$12 sps:$4 sm:$0xff]   ;;  %v1970_v7 = vld [vmem:[%s2358_s5 + $0x170] ss:$12 sps:$4 sm:$0xff]  }
  0x88   : > { %v1968_v5 = vld [vmem:[%s2358_s5 + $0x158] ss:$12 sps:$4 sm:$0xff]  }
  0x8a   : > { %1603 = vmatpush3.bf16.msra.mxu0 %v1896_v15  ;;  %1788 = vmatpush3.bf16.msra.mxu1 %v1896_v15 }
  0x8b   : > { %1604 = vmatprep.subr.bf16.mxu0 %v1897_v16  ;;  %1781 = vmatprep.subr.bf16.mxu1 %v1897_v16 }
  0x8e   : > { %1605 = vmatpush3.bf16.msra.mxu0 %v1898_v17  ;;  %1789 = vmatpush3.bf16.msra.mxu1 %v1898_v17 }
  0x8f   : > { %1726 = vmatprep.subr.bf16.mxu1 %v1905_v18 }
  0x91   : > { %878 = vmatmul.mubr.bf16.vlgmr.msra.gmra.mrb[0].mxu0 %v1899_v19  ;;  %974 = vmatmul.mubr.bf16.vlgmr.msra.gmra.mrb[0].mxu1 %v1902_v20 }
  0x92   : > { %1727 = vmatpush3.bf16.msra.mxu1 %v1905_v18  ;;  %885 = vmatprep.mubr.bf16.mxu0 %v1907_v21 }
  0x93   : > { %1728 = vmatprep.subr.bf16.mxu1 %v1906_v22  ;;  %981 = vmatprep.mubr.bf16.mxu1 %v1909_v23 }
  0x96   : > { %1729 = vmatpush3.bf16.msra.mxu1 %v1906_v22 }
  0x97   : > { %1730 = vmatprep.subr.bf16.mxu1 %v1913_v25 }
  0x99   : > { %886 = vmatmul.mubr.bf16.gmra.mrb[4].mxu0 %v1911_v24  ;;  %982 = vmatmul.mubr.bf16.gmra.mrb[4].mxu1 %v1912_v26 }
  0x9a   : > { %1731 = vmatpush3.bf16.msra.mxu1 %v1913_v25  ;;  %893 = vmatprep.mubr.bf16.mxu0 %v1915_v28 }
  0x9b   : > { %1732 = vmatprep.subr.bf16.mxu1 %v1914_v27  ;;  %989 = vmatprep.mubr.bf16.mxu1 %v1917_v29 }
  0x9e   : > { %1733 = vmatpush3.bf16.msra.mxu1 %v1914_v27 }
  0x9f   : > { %1734 = vmatprep.subr.bf16.mxu1 %v1921_v30 }
  0xa1   : > { %894 = vmatmul.mubr.bf16.gmra.mrb[8].mxu0 %v1919_v31  ;;  %990 = vmatmul.mubr.bf16.gmra.mrb[8].mxu1 %v1920_v32 }
  0xa2   : > { %1735 = vmatpush3.bf16.msra.mxu1 %v1921_v30  ;;  %901 = vmatprep.mubr.bf16.mxu0 %v1923_v34 }
  0xa3   : > { %1736 = vmatprep.subr.bf16.mxu1 %v1922_v33  ;;  %997 = vmatprep.mubr.bf16.mxu1 %v1925_v35 }
  0xa6   : > { %1737 = vmatpush3.bf16.msra.mxu1 %v1922_v33 }
  0xa7   : > { %1738 = vmatprep.subr.bf16.mxu1 %v1929_v36 }
  0xa9   : > { %902 = vmatmul.mubr.bf16.gmra.mrb[12].mxu0 %v1927_v37  ;;  %998 = vmatmul.mubr.bf16.gmra.mrb[12].mxu1 %v1928_v38 }
  0xaa   : > { %1739 = vmatpush3.bf16.msra.mxu1 %v1929_v36  ;;  %909 = vmatprep.mubr.bf16.mxu0 %v1931_v39 }
  0xab   : > { %1740 = vmatprep.subr.bf16.mxu1 %v1930_v40  ;;  %1742 = vmatprep.mubr.bf16.mxu1 %v1933_v41 }
  0xae   : > { %1741 = vmatpush3.bf16.msra.mxu1 %v1930_v40 }
  0xb1   : > { %910 = vmatmul.mubr.bf16.gmra.mrb[16].mxu0 %v1934_v42  ;;  %1743 = vmatmul.mubr.bf16.vlgmr.msra.gmra.mrb[16].mxu1 %v1935_v43 }
  0xb2   : > { %917 = vmatprep.mubr.bf16.mxu0 %v1936_v44  ;;  %1746 = vmatprep.mubr.bf16.mxu1 %v1938_v45 }
  0xb9   : > { %918 = vmatmul.mubr.bf16.gmra.mrb[20].mxu0 %v1939_v46  ;;  %1747 = vmatmul.mubr.bf16.gmra.mrb[20].mxu1 %v1940_v47 }
  0xba   : > { %925 = vmatprep.mubr.bf16.mxu0 %v1941_v48  ;;  %1750 = vmatprep.mubr.bf16.mxu1 %v1943_v49 }
  0xc1   : > { %926 = vmatmul.mubr.bf16.gmra.mrb[24].mxu0 %v1944_v50  ;;  %1751 = vmatmul.mubr.bf16.gmra.mrb[24].mxu1 %v1945_v51 }
  0xc2   : > { %933 = vmatprep.mubr.bf16.mxu0 %v1946_v52  ;;  %1754 = vmatprep.mubr.bf16.mxu1 %v1948_v53 }
  0xc9   : > { %934 = vmatmul.mubr.bf16.gmra.mrb[28].mxu0 %v1949_v54  ;;  %1755 = vmatmul.mubr.bf16.gmra.mrb[28].mxu1 %v1950_v55 }
  0xca   : > { %941 = vmatprep.mubr.bf16.mxu0 %v1951_v56  ;;  %1758 = vmatprep.mubr.bf16.mxu1 %v1953_v57 }
  0xd1   : > { %942 = vmatmul.mubr.bf16.gmra.mrb[32].mxu0 %v1954_v58  ;;  %1759 = vmatmul.mubr.bf16.gmra.mrb[32].mxu1 %v1955_v59 }
  0xd2   : > { %949 = vmatprep.mubr.bf16.mxu0 %v1956_v60  ;;  %1762 = vmatprep.mubr.bf16.mxu1 %v1958_v61  ;;  %v2432_v61 = vld [vmem:[#allocation7] ss:$0 sm:$0xff] }
  0xd9   : > { %950 = vmatmul.mubr.bf16.gmra.mrb[36].mxu0 %v1959_v62  ;;  %1763 = vmatmul.mubr.bf16.gmra.mrb[36].mxu1 %v1960_v63 }
  0xda   : > { %957 = vmatprep.mubr.bf16.mxu0 %v1961_v0  ;;  %1766 = vmatprep.mubr.bf16.mxu1 %v1963_v1 }
  0xe1   : > { %958 = vmatmul.mubr.bf16.gmra.mrb[40].mxu0 %v1964_v2  ;;  %1767 = vmatmul.mubr.bf16.gmra.mrb[40].mxu1 %v1965_v3 }
  0xe2   : > { %965 = vmatprep.mubr.bf16.mxu0 %v1966_v4  ;;  %1770 = vmatprep.mubr.bf16.mxu1 %v1968_v5 }
  0xe9   : > { %966 = vmatmul.mubr.bf16.gmra.mrb[44].mxu0 %v1969_v6  ;;  %1771 = vmatmul.mubr.bf16.gmra.mrb[44].mxu1 %v1970_v7 }
 0x164   : > { %v1606_v8 = vpop.f32.mrb[0].mxu0  ;;  %v1678_v9 = vpop.f32.mrb[0].mxu1 }
 0x165   : > { %v1607_v10 = vpop.f32.mrb[1].mxu0  ;;  %v1679_v11 = vpop.f32.mrb[1].mxu1 }
 0x166   : > { %v1608_v12 = vadd.f32 %v1607_v10, %v1606_v8  ;;  %v2416_v13 = vadd.f32 %v1679_v11, %v1678_v9  ;;  %v1609_v14 = vpop.f32.mrb[2].mxu0  ;;  %v1681_v15 = vpop.f32.mrb[2].mxu1 }
 0x167   : > { %v1610_v16 = vpop.f32.mrb[3].mxu0  ;;  %v1682_v17 = vpop.f32.mrb[3].mxu1 }
 0x168   : > { %v1611_v18 = vadd.f32 %v1610_v16, %v1609_v14  ;;  %v2418_v19 = vadd.f32 %v1682_v17, %v1681_v15 }
 0x16c   : > { %v1612_v20 = vpop.f32.mrb[4].mxu0  ;;  %v1684_v21 = vpop.f32.mrb[4].mxu1 }
 0x16d   : > { %v1613_v22 = vpop.f32.mrb[5].mxu0  ;;  %v1685_v23 = vpop.f32.mrb[5].mxu1 }
 0x16e   : > { %v1614_v24 = vadd.f32 %v1613_v22, %v1612_v20  ;;  %v2420_v25 = vadd.f32 %v1685_v23, %v1684_v21  ;;  %v1615_v26 = vpop.f32.mrb[6].mxu0  ;;  %v1687_v27 = vpop.f32.mrb[6].mxu1 }
 0x16f   : > { %v1616_v28 = vpop.f32.mrb[7].mxu0  ;;  %v1688_v29 = vpop.f32.mrb[7].mxu1 }
 0x170   : > { %v1617_v30 = vadd.f32 %v1616_v28, %v1615_v26  ;;  %v2422_v31 = vadd.f32 %v1688_v29, %v1687_v27 }
 0x174   : > { %v1618_v32 = vpop.f32.mrb[8].mxu0  ;;  %v1690_v33 = vpop.f32.mrb[8].mxu1 }
 0x175   : > { %v1619_v34 = vpop.f32.mrb[9].mxu0  ;;  %v1691_v35 = vpop.f32.mrb[9].mxu1 }
 0x176   : > { %v1620_v36 = vadd.f32 %v1619_v34, %v1618_v32  ;;  %v2424_v37 = vadd.f32 %v1691_v35, %v1690_v33  ;;  %v1621_v38 = vpop.f32.mrb[10].mxu0  ;;  %v1693_v39 = vpop.f32.mrb[10].mxu1 }
 0x177   : > { %v1622_v40 = vpop.f32.mrb[11].mxu0  ;;  %v1694_v41 = vpop.f32.mrb[11].mxu1 }
 0x178   : > { %v1623_v42 = vadd.f32 %v1622_v40, %v1621_v38  ;;  %v2426_v43 = vadd.f32 %v1694_v41, %v1693_v39 }
 0x17c   : > { %v1624_v44 = vpop.f32.mrb[12].mxu0  ;;  %v1696_v45 = vpop.f32.mrb[12].mxu1 }
 0x17d   : > { %v1625_v46 = vpop.f32.mrb[13].mxu0  ;;  %v1697_v47 = vpop.f32.mrb[13].mxu1 }
 0x17e   : > { %v1626_v48 = vadd.f32 %v1625_v46, %v1624_v44  ;;  %v2428_v49 = vadd.f32 %v1697_v47, %v1696_v45  ;;  %v1627_v50 = vpop.f32.mrb[14].mxu0  ;;  %v1699_v51 = vpop.f32.mrb[14].mxu1 }
 0x17f   : > { %v1628_v52 = vpop.f32.mrb[15].mxu0  ;;  %v1700_v53 = vpop.f32.mrb[15].mxu1 }
 0x180   : > { %v1629_v54 = vadd.f32 %v1628_v52, %v1627_v50  ;;  %v2430_v55 = vadd.f32 %v1700_v53, %v1699_v51 }
 0x184   : > { %v1630_v56 = vpop.f32.mrb[16].mxu0  ;;  %v1744_v57 = vpop.f32.mrb[16].mxu1 }
 0x185   : > { %v1049_v58 = vadd.f32 %v1744_v57, %v1614_v24  ;;  %v1631_v59 = vpop.f32.mrb[17].mxu0  ;;  %v1040_v60 = vpop.f32.mrb[17].mxu1 }
 0x186   : > { %v1632_v62 = vadd.f32 %v1631_v59, %v1630_v56  ;;  %v1041_v63 = vadd.f32 %v1608_v12, %v1040_v60  ;;  %v1633_v0 = vpop.f32.mrb[18].mxu0  ;;  %v1745_v1 = vpop.f32.mrb[18].mxu1 }
 0x187   : > { %v1052_v2 = vadd.f32 %v1745_v1, %v1617_v30  ;;  %v1634_v3 = vpop.f32.mrb[19].mxu0  ;;  %v1043_v4 = vpop.f32.mrb[19].mxu1  ;;  %v1275_v7 = vadd.f32 %v2432_v61, %v1049_v58 }
 0x188   : > { %v1635_v5 = vadd.f32 %v1634_v3, %v1633_v0  ;;  %v1044_v6 = vadd.f32 %v1611_v18, %v1043_v4  ;;  %v1273_v8 = vadd.f32 %v2432_v61, %v1041_v63 }
 0x189   : > { %v1307_v9 = vmax.f32 %v1275_v7, 0.0  ;;  %v1276_v10 = vadd.f32 %v2432_v61, %v1052_v2 }
 0x18a   : > { %v1305_v11 = vmax.f32 %v1273_v8, 0.0  ;;  %v1274_v14 = vadd.f32 %v2432_v61, %v1044_v6 }
 0x18b   : > { %1339 = vst [vmem:[%s2439_s22 + $0x10] sm:$0xff] %v1307_v9  ;;  %v1308_v16 = vmax.f32 %v1276_v10, 0.0 }
 0x18c   : > { %v1636_v15 = vpop.f32.mrb[20].mxu0  ;;  %v1748_v12 = vpop.f32.mrb[20].mxu1  ;;  %1337 = vst [vmem:[%s2439_s22] sm:$0xff] %v1305_v11  ;;  %v1306_v21 = vmax.f32 %v1274_v14, 0.0 }
 0x18d   : > { %v1065_v17 = vadd.f32 %v1748_v12, %v1626_v48  ;;  %v1637_v18 = vpop.f32.mrb[21].mxu0  ;;  %v1056_v20 = vpop.f32.mrb[21].mxu1  ;;  %1340 = vst [vmem:[%s2439_s22 + $0x18] sm:$0xff] %v1308_v16 }
 0x18e   : > { %v1638_v22 = vadd.f32 %v1637_v18, %v1636_v15  ;;  %v1057_v23 = vadd.f32 %v1620_v36, %v1056_v20  ;;  %v1639_v24 = vpop.f32.mrb[22].mxu0  ;;  %v1749_v26 = vpop.f32.mrb[22].mxu1  ;;  %1338 = vst [vmem:[%s2439_s22 + $0x8] sm:$0xff] %v1306_v21 }
 0x18f   : > { %v1068_v27 = vadd.f32 %v1749_v26, %v1629_v54  ;;  %v1640_v28 = vpop.f32.mrb[23].mxu0  ;;  %v1059_v29 = vpop.f32.mrb[23].mxu1  ;;  %v1279_v33 = vadd.f32 %v2432_v61, %v1065_v17 }
 0x190   : > { %v1641_v30 = vadd.f32 %v1640_v28, %v1639_v24  ;;  %v1060_v32 = vadd.f32 %v1623_v42, %v1059_v29  ;;  %v1277_v34 = vadd.f32 %v2432_v61, %v1057_v23 }
 0x191   : > { %v1311_v35 = vmax.f32 %v1279_v33, 0.0  ;;  %v1280_v38 = vadd.f32 %v2432_v61, %v1068_v27 }
 0x192   : > { %v1309_v36 = vmax.f32 %v1277_v34, 0.0  ;;  %v1278_v39 = vadd.f32 %v2432_v61, %v1060_v32 }
 0x193   : > { %1343 = vst [vmem:[%s2439_s22 + $0x30] sm:$0xff] %v1311_v35  ;;  %v1312_v44 = vmax.f32 %v1280_v38, 0.0 }
 0x194   : > { %v1642_v40 = vpop.f32.mrb[24].mxu0  ;;  %v1752_v41 = vpop.f32.mrb[24].mxu1  ;;  %1341 = vst [vmem:[%s2439_s22 + $0x20] sm:$0xff] %v1309_v36  ;;  %v1310_v42 = vmax.f32 %v1278_v39, 0.0 }
 0x195   : > { %v1081_v45 = vadd.f32 %v1752_v41, %v1638_v22  ;;  %v1643_v46 = vpop.f32.mrb[25].mxu0  ;;  %v1072_v47 = vpop.f32.mrb[25].mxu1  ;;  %1344 = vst [vmem:[%s2439_s22 + $0x38] sm:$0xff] %v1312_v44 }
 0x196   : > { %v1644_v48 = vadd.f32 %v1643_v46, %v1642_v40  ;;  %v1073_v50 = vadd.f32 %v1632_v62, %v1072_v47  ;;  %v1645_v51 = vpop.f32.mrb[26].mxu0  ;;  %v1753_v52 = vpop.f32.mrb[26].mxu1  ;;  %1342 = vst [vmem:[%s2439_s22 + $0x28] sm:$0xff] %v1310_v42 }
 0x197   : > { %v1084_v53 = vadd.f32 %v1753_v52, %v1641_v30  ;;  %v1646_v54 = vpop.f32.mrb[27].mxu0  ;;  %v1075_v56 = vpop.f32.mrb[27].mxu1  ;;  %v1283_v59 = vadd.f32 %v2432_v61, %v1081_v45 }
 0x198   : > { %v1647_v57 = vadd.f32 %v1646_v54, %v1645_v51  ;;  %v1076_v58 = vadd.f32 %v1635_v5, %v1075_v56  ;;  %v1281_v60 = vadd.f32 %v2432_v61, %v1073_v50 }
 0x199   : > { %v1315_v63 = vmax.f32 %v1283_v59, 0.0  ;;  %v1284_v0 = vadd.f32 %v2432_v61, %v1084_v53 }
 0x19a   : > { %v1313_v62 = vmax.f32 %v1281_v60, 0.0  ;;  %v1282_v1 = vadd.f32 %v2432_v61, %v1076_v58 }
 0x19b   : > { %1347 = vst [vmem:[%s2439_s22 + $0x50] sm:$0xff] %v1315_v63  ;;  %v1316_v4 = vmax.f32 %v1284_v0, 0.0 }
 0x19c   : > { %v1648_v2 = vpop.f32.mrb[28].mxu0  ;;  %v1756_v3 = vpop.f32.mrb[28].mxu1  ;;  %1345 = vst [vmem:[%s2439_s22 + $0x40] sm:$0xff] %v1313_v62  ;;  %v1314_v5 = vmax.f32 %v1282_v1, 0.0 }
 0x19d   : > { %v1649_v6 = vpop.f32.mrb[29].mxu0  ;;  %v1088_v7 = vpop.f32.mrb[29].mxu1  ;;  %1348 = vst [vmem:[%s2439_s22 + $0x58] sm:$0xff] %v1316_v4 }
 0x19e   : > { %v1650_v8 = vadd.f32 %v1649_v6, %v1648_v2  ;;  %v1089_v9 = vadd.f32 %v1644_v48, %v1088_v7  ;;  %v1651_v10 = vpop.f32.mrb[30].mxu0  ;;  %v1757_v11 = vpop.f32.mrb[30].mxu1  ;;  %1346 = vst [vmem:[%s2439_s22 + $0x48] sm:$0xff] %v1314_v5 }
 0x19f   : > { %v1652_v14 = vpop.f32.mrb[31].mxu0  ;;  %v1091_v15 = vpop.f32.mrb[31].mxu1 }
 0x1a0   : > { %v1097_v12 = vadd.f32 %v1756_v3, %v1650_v8  ;;  %v1653_v16 = vadd.f32 %v1652_v14, %v1651_v10  ;;  %v1092_v17 = vadd.f32 %v1647_v57, %v1091_v15  ;;  %v1285_v18 = vadd.f32 %v2432_v61, %v1089_v9 }
 0x1a2   : > { %v1100_v20 = vadd.f32 %v1757_v11, %v1653_v16  ;;  %v1287_v21 = vadd.f32 %v2432_v61, %v1097_v12  ;;  %v1317_v22 = vmax.f32 %v1285_v18, 0.0  ;;  %v1286_v23 = vadd.f32 %v2432_v61, %v1092_v17 }
 0x1a4   : > { %v1654_v24 = vpop.f32.mrb[32].mxu0  ;;  %v1760_v26 = vpop.f32.mrb[32].mxu1  ;;  %v1319_v29 = vmax.f32 %v1287_v21, 0.0  ;;  %1349 = vst [vmem:[%s2439_s22 + $0x60] sm:$0xff] %v1317_v22  ;;  %v1288_v30 = vadd.f32 %v2432_v61, %v1100_v20  ;;  %v1318_v32 = vmax.f32 %v1286_v23, 0.0 }
 0x1a5   : > { %v1655_v27 = vpop.f32.mrb[33].mxu0  ;;  %v1104_v28 = vpop.f32.mrb[33].mxu1 }
 0x1a6   : > { %v1656_v33 = vadd.f32 %v1655_v27, %v1654_v24  ;;  %v1657_v34 = vpop.f32.mrb[34].mxu0  ;;  %v1761_v35 = vpop.f32.mrb[34].mxu1  ;;  %1351 = vst [vmem:[%s2439_s22 + $0x70] sm:$0xff] %v1319_v29  ;;  %v1320_v39 = vmax.f32 %v1288_v30, 0.0  ;;  %1350 = vst [vmem:[%s2439_s22 + $0x68] sm:$0xff] %v1318_v32 }
 0x1a7   : > { %v1658_v38 = vpop.f32.mrb[35].mxu0  ;;  %v1107_v36 = vpop.f32.mrb[35].mxu1 }
 0x1a8   : > { %v1105_v40 = vadd.f32 %v1656_v33, %v1104_v28  ;;  %v1659_v41 = vadd.f32 %v1658_v38, %v1657_v34  ;;  %1352 = vst [vmem:[%s2439_s22 + $0x78] sm:$0xff] %v1320_v39 }
 0x1aa   : > { %v1108_v44 = vadd.f32 %v1659_v41, %v1107_v36  ;;  %v1289_v45 = vadd.f32 %v2432_v61, %v1105_v40 }
 0x1ac   : > { %v1660_v46 = vpop.f32.mrb[36].mxu0  ;;  %v2470_v47 = vpop.f32.mrb[36].mxu1  ;;  %v1321_v50 = vmax.f32 %v1289_v45, 0.0  ;;  %v1290_v51 = vadd.f32 %v2432_v61, %v1108_v44 }
 0x1ad   : > { %v1661_v42 = vpop.f32.mrb[37].mxu0  ;;  %v1120_v48 = vpop.f32.mrb[37].mxu1 }
 0x1ae   : > { %v1662_v52 = vadd.f32 %v1661_v42, %v1660_v46  ;;  %v1663_v53 = vpop.f32.mrb[38].mxu0  ;;  %v2473_v54 = vpop.f32.mrb[38].mxu1  ;;  %1353 = vst [vmem:[%s2439_s22 + $0x80] sm:$0xff] %v1321_v50  ;;  %v1322_v58 = vmax.f32 %v1290_v51, 0.0 }
 0x1af   : > { %v1664_v56 = vpop.f32.mrb[39].mxu0  ;;  %v1123_v57 = vpop.f32.mrb[39].mxu1 }
 0x1b0   : > { %v1113_v59 = vadd.f32 %v1760_v26, %v1662_v52  ;;  %v1665_v60 = vadd.f32 %v1664_v56, %v1663_v53  ;;  %1354 = vst [vmem:[%s2439_s22 + $0x88] sm:$0xff] %v1322_v58 }
 0x1b2   : > { %v1116_v63 = vadd.f32 %v1761_v35, %v1665_v60  ;;  %v1291_v0 = vadd.f32 %v2432_v61, %v1113_v59 }
 0x1b4   : > { %v1666_v62 = vpop.f32.mrb[40].mxu0  ;;  %v1768_v1 = vpop.f32.mrb[40].mxu1  ;;  %v1323_v6 = vmax.f32 %v1291_v0, 0.0  ;;  %v1292_v7 = vadd.f32 %v2432_v61, %v1116_v63 }
 0x1b5   : > { %v1145_v2 = vadd.f32 %v1768_v1, %v2420_v25  ;;  %v1667_v3 = vpop.f32.mrb[41].mxu0  ;;  %v1136_v4 = vpop.f32.mrb[41].mxu1 }
 0x1b6   : > { %v1668_v5 = vadd.f32 %v1667_v3, %v1666_v62  ;;  %v1137_v8 = vadd.f32 %v2416_v13, %v1136_v4  ;;  %v1669_v9 = vpop.f32.mrb[42].mxu0  ;;  %v1769_v10 = vpop.f32.mrb[42].mxu1  ;;  %1355 = vst [vmem:[%s2439_s22 + $0x90] sm:$0xff] %v1323_v6  ;;  %v1324_v12 = vmax.f32 %v1292_v7, 0.0 }
 0x1b7   : > { %v1148_v11 = vadd.f32 %v1769_v10, %v2422_v31  ;;  %v1670_v14 = vpop.f32.mrb[43].mxu0  ;;  %v1139_v15 = vpop.f32.mrb[43].mxu1  ;;  %v1299_v17 = vadd.f32 %v2432_v61, %v1145_v2 }
 0x1b8   : > { %v1121_v16 = vadd.f32 %v1668_v5, %v1120_v48  ;;  %v1671_v25 = vadd.f32 %v1670_v14, %v1669_v9  ;;  %v1140_v18 = vadd.f32 %v2418_v19, %v1139_v15  ;;  %1356 = vst [vmem:[%s2439_s22 + $0x98] sm:$0xff] %v1324_v12  ;;  %v1297_v20 = vadd.f32 %v2432_v61, %v1137_v8 }
 0x1b9   : > { %v1331_v21 = vmax.f32 %v1299_v17, 0.0  ;;  %v1300_v22 = vadd.f32 %v2432_v61, %v1148_v11 }
 0x1ba   : > { %v1124_v13 = vadd.f32 %v1671_v25, %v1123_v57  ;;  %v1293_v31 = vadd.f32 %v2432_v61, %v1121_v16  ;;  %v1329_v23 = vmax.f32 %v1297_v20, 0.0  ;;  %v1298_v28 = vadd.f32 %v2432_v61, %v1140_v18 }
 0x1bb   : > { %1363 = vst [vmem:[%s2439_s22 + $0xd0] sm:$0xff] %v1331_v21  ;;  %v1332_v27 = vmax.f32 %v1300_v22, 0.0 }
 0x1bc   : > { %v1672_v24 = vpop.f32.mrb[44].mxu0  ;;  %v1772_v26 = vpop.f32.mrb[44].mxu1  ;;  %v1325_v32 = vmax.f32 %v1293_v31, 0.0  ;;  %1361 = vst [vmem:[%s2439_s22 + $0xc0] sm:$0xff] %v1329_v23  ;;  %v1294_v33 = vadd.f32 %v2432_v61, %v1124_v13  ;;  %v1330_v39 = vmax.f32 %v1298_v28, 0.0 }
 0x1bd   : > { %v1161_v19 = vadd.f32 %v1772_v26, %v2428_v49  ;;  %v1673_v29 = vpop.f32.mrb[45].mxu0  ;;  %v1152_v30 = vpop.f32.mrb[45].mxu1  ;;  %1364 = vst [vmem:[%s2439_s22 + $0xd8] sm:$0xff] %v1332_v27 }
 0x1be   : > { %v1674_v34 = vadd.f32 %v1673_v29, %v1672_v24  ;;  %v1153_v35 = vadd.f32 %v2424_v37, %v1152_v30  ;;  %v1675_v38 = vpop.f32.mrb[46].mxu0  ;;  %v1773_v36 = vpop.f32.mrb[46].mxu1  ;;  %1357 = vst [vmem:[%s2439_s22 + $0xa0] sm:$0xff] %v1325_v32  ;;  %v1326_v44 = vmax.f32 %v1294_v33, 0.0  ;;  %1362 = vst [vmem:[%s2439_s22 + $0xc8] sm:$0xff] %v1330_v39 }
 0x1bf   : > { %v1164_v40 = vadd.f32 %v1773_v36, %v2430_v55  ;;  %v1676_v41 = vpop.f32.mrb[47].mxu0  ;;  %v1155_v49 = vpop.f32.mrb[47].mxu1  ;;  %v1303_v37 = vadd.f32 %v2432_v61, %v1161_v19 }
 0x1c0   : > { %v1129_v45 = vadd.f32 %v2470_v47, %v1674_v34  ;;  %v1677_v46 = vadd.f32 %v1676_v41, %v1675_v38  ;;  %v1156_v42 = vadd.f32 %v2426_v43, %v1155_v49  ;;  %1358 = vst [vmem:[%s2439_s22 + $0xa8] sm:$0xff] %v1326_v44  ;;  %v1301_v55 = vadd.f32 %v2432_v61, %v1153_v35 }
 0x1c1   : > { %v1335_v50 = vmax.f32 %v1303_v37, 0.0  ;;  %v1304_v51 = vadd.f32 %v2432_v61, %v1164_v40 }
 0x1c2   : > { %v1132_v48 = vadd.f32 %v2473_v54, %v1677_v46  ;;  %v1295_v52 = vadd.f32 %v2432_v61, %v1129_v45  ;;  %v1333_v47 = vmax.f32 %v1301_v55, 0.0  ;;  %v1302_v53 = vadd.f32 %v2432_v61, %v1156_v42 }
 0x1c3   : > { %1367 = vst [vmem:[%s2439_s22 + $0xf0] sm:$0xff] %v1335_v50  ;;  %v1336_v43 = vmax.f32 %v1304_v51, 0.0 }
 0x1c4   : > { %v1327_v56 = vmax.f32 %v1295_v52, 0.0  ;;  %1365 = vst [vmem:[%s2439_s22 + $0xe0] sm:$0xff] %v1333_v47  ;;  %v1296_v54 = vadd.f32 %v2432_v61, %v1132_v48  ;;  %v1334_v57 = vmax.f32 %v1302_v53, 0.0 }
 0x1c5   : > { %1368 = vst [vmem:[%s2439_s22 + $0xf8] sm:$0xff] %v1336_v43 }
 0x1c6   : > { %1359 = vst [vmem:[%s2439_s22 + $0xb0] sm:$0xff] %v1327_v56  ;;  %v1328_v58 = vmax.f32 %v1296_v54, 0.0  ;;  %1366 = vst [vmem:[%s2439_s22 + $0xe8] sm:$0xff] %v1334_v57 }
 0x1c8   : > { %1360 = vst [vmem:[%s2439_s22 + $0xb8] sm:$0xff] %v1328_v58 }
 0x1c9   : > { %2070 = shalt.err (!%p2067_p5)
}
 0x1ca   : > { %s2071_s10 = scalar_lea.hbm %s2517_s9, 4096  ;;  %s2075_s29 = scalar_lea.hbm %s2573_s3, 49152 }
 0x1cb   : > { %p2072_p9 = scmp.ne.s32.totalorder %s2517_s9, %s2071_s10  ;;  %p2076_p3 = scmp.lt.u32.totalorder %s2517_s9, %s2573_s3 }
 0x1cc   : > { %p2077_p7 = scmp.lt.u32.totalorder %s2075_s29, %s2071_s10  ;;  %p2079_p1 = scmp.lt.u32.totalorder %s2071_s10, %s2517_s9 }
 0x1cd   : > { %p2073_p12 = pnand %p2072_p9, %p2301_p8 }
 0x1ce   : > { %p2078_p10 = por %p2077_p7, %p2076_p3 }
 0x1cf   : > { %p2074_p11 = pneg %p2073_p12 }
 0x1d0   : > { %p2080_p2 = por %p2079_p1, %p2078_p10 }
 0x1d2   : > { %p2081_p4 = pnand %p2080_p2, %p2074_p11 }
 0x1d4   : > { %2084 = shalt.err (!%p2081_p4)
}
 0x1d5   : > { %s2153_s22 = smov 128   ;;  %s2154_s24 = smov 8  }
 0x1d6   : > { %1803 = dma.vmem_to_hbm [thread:$0]  (%p2301_p8), %s2519_s30, 4096, %s2517_s9, %s1370_s15, %s2153_s22, %s2153_s22, %s2154_s24  }
 0x1d7 PF: > { %p1825_p6 = scmp.ge.s32.totalorder %s2143_s17, 2  ;;  %s1399_s7 = sand.u32 1, %s2123_s12  }
 0x1d8   : > { %p2590_p13 = scmp.ne.s32.totalorder %s2581_s23, 0  ;;  %s1400_s26 = scalar_lea.sflag [#allocation4], %s1399_s7 }
 0x1da   : > { %p1817_p0 = pnand %p1825_p6, %p2590_p13 }
 0x1dc   : > { %2118 = dma.done.wait (!%p1817_p0), %s1400_s26, 4096  }
 0x1dd   : > { %2120 = vsyncadd (!%p1817_p0), %s1400_s26, 4294963200  ;;  %s20_s17 = sadd.s32 1, %s2143_s17   ;;  %s2591_s12 = smov %s2127_s13 }
 0x1de   : > { %p17_p5 = scmp.ge.s32.totalorder %s20_s17, 14   ;;  %s2592_s13 = smov %s2131_s14 }
 0x1df   : > { %s2593_s14 = smov %s2313_s4  ;;  %s2594_s15 = smov %s2139_s16 }
 0x1e0   : > { %s2595_s16 = smov %s2597_s18  ;;  %19 = sbr.rel (!%p17_p5) target bundleno = 7 (0x7), region = 95 }
 0x1e7   :  { %1405 = vsyncpa [#allocation3], 1 }
 0x1e8   :  { %1407 = vsyncpa [#allocation3 + $0x1], 1 }
 0x1e9   :  { %1408 = vsyncpa [#allocation6], 1 }
 0x1ea   :  { %1409 = vsyncpa [#allocation4], 1 }
 0x1eb   :  { %1411 = vsyncpa [#allocation4 + $0x1], 1 }

</bundles_post_ra>
